<compile_context>
chip_gen: v6e
topology: v6e:2x2x1
jax: 0.10.0
libtpu: 0.0.40
codegen_flags: <defaults>
</compile_context>

<pallas_src>
import functools

import jax
import jax.numpy as jnp
import numpy as np
from jax.experimental import pallas as pl
from jax.experimental.pallas import tpu as pltpu


def _step_layer_kernel(x_ref, w1_ref, w2_ref, out_ref, *, C, N, H, W):
    """x_ref/out_ref: (H, C*N*W); w*_ref: (C*9+1, C*N*W) packed weights+bias."""
    GROUP = N * W          # lanes per output channel
    L = C * GROUP          # total lane width

    # Edge masks, shared by both convs (lane position -> x, sublane -> y).
    lane_x = jax.lax.broadcasted_iota(jnp.int32, (1, L), 1) % W
    not_left = lane_x > 0            # dx = -1 taps valid
    not_right = lane_x < W - 1       # dx = +1 taps valid
    row_y = jax.lax.broadcasted_iota(jnp.int32, (H, 1), 0)
    not_top = row_y > 0              # dy = -1 taps valid
    not_bot = row_y < H - 1          # dy = +1 taps valid

    def conv3x3_relu(src, w):
        # src: (H, L); w: (C*9+1, L); row index = d*9 + kh*3 + kw, bias = row C*9.
        bias = w[C * 9:C * 9 + 1, :]                       # (1, L)

        # Channel-rotated bases: bases[d][y, l] holds input channel (co+d)%C at
        # the same (n, x) as lane l.  Pure lane rotation (XLU), no masks needed.
        bases = [src]
        for d in range(1, C):
            bases.append(pltpu.roll(src, (L - d * GROUP) % L, axis=1))

        # Per-tap input-channel contraction (9 independent short chains -> ILP).
        def z(k):
            acc = bases[0] * w[k:k + 1, :]
            for d in range(1, C):
                acc = acc + bases[d] * w[d * 9 + k:d * 9 + k + 1, :]
            return acc

        # Spatial assembly, factored by kh: x-shifts (lane rolls) first, then
        # y-shifts (sublane rolls) on the per-row sums.
        def xrow(kh):
            left = jnp.where(not_left,
                             pltpu.roll(z(kh * 3 + 0), 1, axis=1), 0.0)       # dx=-1
            right = jnp.where(not_right,
                              pltpu.roll(z(kh * 3 + 2), L - 1, axis=1), 0.0)  # dx=+1
            return left + z(kh * 3 + 1) + right

        s0, s1, s2 = xrow(0), xrow(1), xrow(2)
        up = jnp.where(not_top, pltpu.roll(s0, 1, axis=0), 0.0)          # dy=-1
        down = jnp.where(not_bot, pltpu.roll(s2, H - 1, axis=0), 0.0)    # dy=+1
        return jnp.maximum(bias + s1 + up + down, 0.0)

    h1 = conv3x3_relu(x_ref[...], w1_ref[...])       # intermediate stays in registers
    out_ref[...] = conv3x3_relu(h1, w2_ref[...])


def _pack_weights(w_oihw, b, C, N, W):
    """Torch-layout (C,C,3,3) + (C,) -> one lane-dense (C*9+1, C*N*W) tile."""
    L = C * N * W
    co = jnp.arange(L) // (N * W)                    # output channel of every lane
    rows = []
    for d in range(C):
        ci = (co + d) % C
        for kh in range(3):
            for kw in range(3):
                rows.append(w_oihw[co, ci, kh, kw])  # row d*9 + kh*3 + kw
    rows.append(b[co])                               # bias row (index C*9)
    return jnp.stack(rows, axis=0)


@jax.jit
def step_layer_pallas(x_nchw, w1, b1, w2, b2):
    """x_nchw: (N, C, H, W) float32; weights in torch layout (C_out, C_in, 3, 3)."""
    N, C, H, W = x_nchw.shape
    L = C * N * W
    # (N,C,H,W) -> (H, C, N, W) -> (H, C*N*W): y on sublanes, (c, n, x) on lanes.
    x_packed = jnp.transpose(x_nchw, (2, 1, 0, 3)).reshape(H, L)

    out = pl.pallas_call(
        functools.partial(_step_layer_kernel, C=C, N=N, H=H, W=W),
        out_shape=jax.ShapeDtypeStruct((H, L), jnp.float32),
    )(x_packed,
      _pack_weights(w1, b1, C, N, W),
      _pack_weights(w2, b2, C, N, W))

    return jnp.transpose(out.reshape(H, C, N, W), (2, 1, 0, 3))


def step_layer_ref(x_nchw, w1_oihw, b1, w2_oihw, b2):
    dn = ("NCHW", "OIHW", "NCHW")
    y = jax.lax.conv_general_dilated(x_nchw, w1_oihw, (1, 1), "SAME",
                                     dimension_numbers=dn,
                                     precision=jax.lax.Precision.HIGHEST)
    y = jax.nn.relu(y + b1.reshape(1, -1, 1, 1))
    y = jax.lax.conv_general_dilated(y, w2_oihw, (1, 1), "SAME",
                                     dimension_numbers=dn,
                                     precision=jax.lax.Precision.HIGHEST)
    return jax.nn.relu(y + b2.reshape(1, -1, 1, 1))


if __name__ == "__main__":
    N, C, H, W = 2, 4, 16, 16
    key = jax.random.PRNGKey(0)
    kx, kw1, kb1, kw2, kb2 = jax.random.split(key, 5)

    # Deterministic PyTorch-style init: U(-bound, bound), bound = 1/sqrt(C*3*3)
    bound = 1.0 / np.sqrt(C * 3 * 3)
    x = jax.random.normal(kx, (N, C, H, W), dtype=jnp.float32)
    w1 = jax.random.uniform(kw1, (C, C, 3, 3), jnp.float32, -bound, bound)
    b1 = jax.random.uniform(kb1, (C,), jnp.float32, -bound, bound)
    w2 = jax.random.uniform(kw2, (C, C, 3, 3), jnp.float32, -bound, bound)
    b2 = jax.random.uniform(kb2, (C,), jnp.float32, -bound, bound)

    out = jax.block_until_ready(step_layer_pallas(x, w1, b1, w2, b2))
    ref = jax.block_until_ready(step_layer_ref(x, w1, b1, w2, b2))

    assert out.shape == (N, C, H, W)
    np.testing.assert_allclose(np.asarray(out), np.asarray(ref), rtol=1e-5, atol=1e-5)
    print("KERNEL_OK")
</pallas_src>

<mosaic_0001>
module attributes {stable_mosaic.version = 11 : i64} {
  func.func @_step_layer_kernel(%arg0: memref<16x128xf32, #tpu.memory_space<vmem>>, %arg1: memref<37x128xf32, #tpu.memory_space<vmem>>, %arg2: memref<37x128xf32, #tpu.memory_space<vmem>>, %arg3: memref<16x128xf32, #tpu.memory_space<vmem>>) attributes {dimension_semantics = [], scalar_prefetch = 0 : i64, scratch_operands = 0 : i64, tpu.core_type = #tpu.core_type<tc>} {
    %0 = tpu.iota {dimensions = array<i32: 1>} : vector<1x128xi32>
    %c16_i32 = arith.constant 16 : i32
    %c0_i32 = arith.constant 0 : i32
    %1 = arith.cmpi eq, %c16_i32, %c0_i32 : i32
    %c1_i32 = arith.constant 1 : i32
    %2 = arith.select %1, %c1_i32, %c16_i32 : i32
    %3 = vector.broadcast %2 : i32 to vector<1x128xi32>
    %4 = arith.remsi %0, %3 : vector<1x128xi32>
    %c0_i32_0 = arith.constant 0 : i32
    %5 = vector.broadcast %c0_i32_0 : i32 to vector<1x128xi32>
    %6 = arith.cmpi ne, %4, %5 : vector<1x128xi32>
    %c0_i32_1 = arith.constant 0 : i32
    %7 = vector.broadcast %c0_i32_1 : i32 to vector<1x128xi32>
    %8 = arith.cmpi slt, %4, %7 : vector<1x128xi32>
    %c0_i32_2 = arith.constant 0 : i32
    %9 = arith.cmpi slt, %2, %c0_i32_2 : i32
    %10 = vector.broadcast %9 : i1 to vector<1x128xi1>
    %11 = vector.broadcast %10 : vector<1x128xi1> to vector<1x128xi1>
    %12 = arith.xori %8, %11 : vector<1x128xi1>
    %13 = arith.andi %12, %6 : vector<1x128xi1>
    %14 = vector.broadcast %2 : i32 to vector<1x128xi32>
    %15 = arith.addi %4, %14 : vector<1x128xi32>
    %16 = arith.select %13, %15, %4 : vector<1x128xi1>, vector<1x128xi32>
    %c0_i32_3 = arith.constant 0 : i32
    %17 = vector.broadcast %c0_i32_3 : i32 to vector<1x128xi32>
    %18 = arith.cmpi sgt, %16, %17 : vector<1x128xi32>
    %c15_i32 = arith.constant 15 : i32
    %19 = vector.broadcast %c15_i32 : i32 to vector<1x128xi32>
    %20 = arith.cmpi slt, %16, %19 : vector<1x128xi32>
    %21 = tpu.iota {dimensions = array<i32: 0>} : vector<16x1xi32>
    %c0_i32_4 = arith.constant 0 : i32
    %22 = vector.broadcast %c0_i32_4 : i32 to vector<16x1xi32>
    %23 = arith.cmpi sgt, %21, %22 : vector<16x1xi32>
    %c15_i32_5 = arith.constant 15 : i32
    %24 = vector.broadcast %c15_i32_5 : i32 to vector<16x1xi32>
    %25 = arith.cmpi slt, %21, %24 : vector<16x1xi32>
    %c0 = arith.constant 0 : index
    %c0_6 = arith.constant 0 : index
    %26 = vector.load %arg0[%c0, %c0_6] : memref<16x128xf32, #tpu.memory_space<vmem>>, vector<16x128xf32>
    %c0_7 = arith.constant 0 : index
    %c0_8 = arith.constant 0 : index
    %27 = vector.load %arg1[%c0_7, %c0_8] : memref<37x128xf32, #tpu.memory_space<vmem>>, vector<37x128xf32>
    %28 = vector.extract_strided_slice %27 {offsets = [36, 0], sizes = [1, 128], strides = [1, 1]} : vector<37x128xf32> to vector<1x128xf32>
    %c96_i32 = arith.constant 96 : i32
    %29 = tpu.dynamic_rotate %26 by %c96_i32 dim 1 : vector<16x128xf32>, i32 -> vector<16x128xf32>
    %c64_i32 = arith.constant 64 : i32
    %30 = tpu.dynamic_rotate %26 by %c64_i32 dim 1 : vector<16x128xf32>, i32 -> vector<16x128xf32>
    %c32_i32 = arith.constant 32 : i32
    %31 = tpu.dynamic_rotate %26 by %c32_i32 dim 1 : vector<16x128xf32>, i32 -> vector<16x128xf32>
    %32 = vector.extract_strided_slice %27 {offsets = [0, 0], sizes = [1, 128], strides = [1, 1]} : vector<37x128xf32> to vector<1x128xf32>
    %33 = vector.broadcast %32 : vector<1x128xf32> to vector<16x128xf32>
    %34 = arith.mulf %26, %33 : vector<16x128xf32>
    %35 = vector.extract_strided_slice %27 {offsets = [9, 0], sizes = [1, 128], strides = [1, 1]} : vector<37x128xf32> to vector<1x128xf32>
    %36 = vector.broadcast %35 : vector<1x128xf32> to vector<16x128xf32>
    %37 = arith.mulf %29, %36 : vector<16x128xf32>
    %38 = arith.addf %34, %37 : vector<16x128xf32>
    %39 = vector.extract_strided_slice %27 {offsets = [18, 0], sizes = [1, 128], strides = [1, 1]} : vector<37x128xf32> to vector<1x128xf32>
    %40 = vector.broadcast %39 : vector<1x128xf32> to vector<16x128xf32>
    %41 = arith.mulf %30, %40 : vector<16x128xf32>
    %42 = arith.addf %38, %41 : vector<16x128xf32>
    %43 = vector.extract_strided_slice %27 {offsets = [27, 0], sizes = [1, 128], strides = [1, 1]} : vector<37x128xf32> to vector<1x128xf32>
    %44 = vector.broadcast %43 : vector<1x128xf32> to vector<16x128xf32>
    %45 = arith.mulf %31, %44 : vector<16x128xf32>
    %46 = arith.addf %42, %45 : vector<16x128xf32>
    %c1_i32_9 = arith.constant 1 : i32
    %47 = tpu.dynamic_rotate %46 by %c1_i32_9 dim 1 : vector<16x128xf32>, i32 -> vector<16x128xf32>
    %cst = arith.constant 0.000000e+00 : f32
    %48 = vector.shape_cast %18 : vector<1x128xi1> to vector<1x128xi1>
    %49 = vector.broadcast %48 : vector<1x128xi1> to vector<16x128xi1>
    %50 = vector.broadcast %cst : f32 to vector<16x128xf32>
    %51 = arith.select %49, %47, %50 : vector<16x128xi1>, vector<16x128xf32>
    %52 = vector.extract_strided_slice %27 {offsets = [2, 0], sizes = [1, 128], strides = [1, 1]} : vector<37x128xf32> to vector<1x128xf32>
    %53 = vector.broadcast %52 : vector<1x128xf32> to vector<16x128xf32>
    %54 = arith.mulf %26, %53 : vector<16x128xf32>
    %55 = vector.extract_strided_slice %27 {offsets = [11, 0], sizes = [1, 128], strides = [1, 1]} : vector<37x128xf32> to vector<1x128xf32>
    %56 = vector.broadcast %55 : vector<1x128xf32> to vector<16x128xf32>
    %57 = arith.mulf %29, %56 : vector<16x128xf32>
    %58 = arith.addf %54, %57 : vector<16x128xf32>
    %59 = vector.extract_strided_slice %27 {offsets = [20, 0], sizes = [1, 128], strides = [1, 1]} : vector<37x128xf32> to vector<1x128xf32>
    %60 = vector.broadcast %59 : vector<1x128xf32> to vector<16x128xf32>
    %61 = arith.mulf %30, %60 : vector<16x128xf32>
    %62 = arith.addf %58, %61 : vector<16x128xf32>
    %63 = vector.extract_strided_slice %27 {offsets = [29, 0], sizes = [1, 128], strides = [1, 1]} : vector<37x128xf32> to vector<1x128xf32>
    %64 = vector.broadcast %63 : vector<1x128xf32> to vector<16x128xf32>
    %65 = arith.mulf %31, %64 : vector<16x128xf32>
    %66 = arith.addf %62, %65 : vector<16x128xf32>
    %c127_i32 = arith.constant 127 : i32
    %67 = tpu.dynamic_rotate %66 by %c127_i32 dim 1 : vector<16x128xf32>, i32 -> vector<16x128xf32>
    %cst_10 = arith.constant 0.000000e+00 : f32
    %68 = vector.shape_cast %20 : vector<1x128xi1> to vector<1x128xi1>
    %69 = vector.broadcast %68 : vector<1x128xi1> to vector<16x128xi1>
    %70 = vector.broadcast %cst_10 : f32 to vector<16x128xf32>
    %71 = arith.select %69, %67, %70 : vector<16x128xi1>, vector<16x128xf32>
    %72 = vector.extract_strided_slice %27 {offsets = [1, 0], sizes = [1, 128], strides = [1, 1]} : vector<37x128xf32> to vector<1x128xf32>
    %73 = vector.broadcast %72 : vector<1x128xf32> to vector<16x128xf32>
    %74 = arith.mulf %26, %73 : vector<16x128xf32>
    %75 = vector.extract_strided_slice %27 {offsets = [10, 0], sizes = [1, 128], strides = [1, 1]} : vector<37x128xf32> to vector<1x128xf32>
    %76 = vector.broadcast %75 : vector<1x128xf32> to vector<16x128xf32>
    %77 = arith.mulf %29, %76 : vector<16x128xf32>
    %78 = arith.addf %74, %77 : vector<16x128xf32>
    %79 = vector.extract_strided_slice %27 {offsets = [19, 0], sizes = [1, 128], strides = [1, 1]} : vector<37x128xf32> to vector<1x128xf32>
    %80 = vector.broadcast %79 : vector<1x128xf32> to vector<16x128xf32>
    %81 = arith.mulf %30, %80 : vector<16x128xf32>
    %82 = arith.addf %78, %81 : vector<16x128xf32>
    %83 = vector.extract_strided_slice %27 {offsets = [28, 0], sizes = [1, 128], strides = [1, 1]} : vector<37x128xf32> to vector<1x128xf32>
    %84 = vector.broadcast %83 : vector<1x128xf32> to vector<16x128xf32>
    %85 = arith.mulf %31, %84 : vector<16x128xf32>
    %86 = arith.addf %82, %85 : vector<16x128xf32>
    %87 = arith.addf %51, %86 : vector<16x128xf32>
    %88 = arith.addf %87, %71 : vector<16x128xf32>
    %89 = vector.extract_strided_slice %27 {offsets = [3, 0], sizes = [1, 128], strides = [1, 1]} : vector<37x128xf32> to vector<1x128xf32>
    %90 = vector.broadcast %89 : vector<1x128xf32> to vector<16x128xf32>
    %91 = arith.mulf %26, %90 : vector<16x128xf32>
    %92 = vector.extract_strided_slice %27 {offsets = [12, 0], sizes = [1, 128], strides = [1, 1]} : vector<37x128xf32> to vector<1x128xf32>
    %93 = vector.broadcast %92 : vector<1x128xf32> to vector<16x128xf32>
    %94 = arith.mulf %29, %93 : vector<16x128xf32>
    %95 = arith.addf %91, %94 : vector<16x128xf32>
    %96 = vector.extract_strided_slice %27 {offsets = [21, 0], sizes = [1, 128], strides = [1, 1]} : vector<37x128xf32> to vector<1x128xf32>
    %97 = vector.broadcast %96 : vector<1x128xf32> to vector<16x128xf32>
    %98 = arith.mulf %30, %97 : vector<16x128xf32>
    %99 = arith.addf %95, %98 : vector<16x128xf32>
    %100 = vector.extract_strided_slice %27 {offsets = [30, 0], sizes = [1, 128], strides = [1, 1]} : vector<37x128xf32> to vector<1x128xf32>
    %101 = vector.broadcast %100 : vector<1x128xf32> to vector<16x128xf32>
    %102 = arith.mulf %31, %101 : vector<16x128xf32>
    %103 = arith.addf %99, %102 : vector<16x128xf32>
    %c1_i32_11 = arith.constant 1 : i32
    %104 = tpu.dynamic_rotate %103 by %c1_i32_11 dim 1 : vector<16x128xf32>, i32 -> vector<16x128xf32>
    %cst_12 = arith.constant 0.000000e+00 : f32
    %105 = vector.shape_cast %18 : vector<1x128xi1> to vector<1x128xi1>
    %106 = vector.broadcast %105 : vector<1x128xi1> to vector<16x128xi1>
    %107 = vector.broadcast %cst_12 : f32 to vector<16x128xf32>
    %108 = arith.select %106, %104, %107 : vector<16x128xi1>, vector<16x128xf32>
    %109 = vector.extract_strided_slice %27 {offsets = [5, 0], sizes = [1, 128], strides = [1, 1]} : vector<37x128xf32> to vector<1x128xf32>
    %110 = vector.broadcast %109 : vector<1x128xf32> to vector<16x128xf32>
    %111 = arith.mulf %26, %110 : vector<16x128xf32>
    %112 = vector.extract_strided_slice %27 {offsets = [14, 0], sizes = [1, 128], strides = [1, 1]} : vector<37x128xf32> to vector<1x128xf32>
    %113 = vector.broadcast %112 : vector<1x128xf32> to vector<16x128xf32>
    %114 = arith.mulf %29, %113 : vector<16x128xf32>
    %115 = arith.addf %111, %114 : vector<16x128xf32>
    %116 = vector.extract_strided_slice %27 {offsets = [23, 0], sizes = [1, 128], strides = [1, 1]} : vector<37x128xf32> to vector<1x128xf32>
    %117 = vector.broadcast %116 : vector<1x128xf32> to vector<16x128xf32>
    %118 = arith.mulf %30, %117 : vector<16x128xf32>
    %119 = arith.addf %115, %118 : vector<16x128xf32>
    %120 = vector.extract_strided_slice %27 {offsets = [32, 0], sizes = [1, 128], strides = [1, 1]} : vector<37x128xf32> to vector<1x128xf32>
    %121 = vector.broadcast %120 : vector<1x128xf32> to vector<16x128xf32>
    %122 = arith.mulf %31, %121 : vector<16x128xf32>
    %123 = arith.addf %119, %122 : vector<16x128xf32>
    %c127_i32_13 = arith.constant 127 : i32
    %124 = tpu.dynamic_rotate %123 by %c127_i32_13 dim 1 : vector<16x128xf32>, i32 -> vector<16x128xf32>
    %cst_14 = arith.constant 0.000000e+00 : f32
    %125 = vector.shape_cast %20 : vector<1x128xi1> to vector<1x128xi1>
    %126 = vector.broadcast %125 : vector<1x128xi1> to vector<16x128xi1>
    %127 = vector.broadcast %cst_14 : f32 to vector<16x128xf32>
    %128 = arith.select %126, %124, %127 : vector<16x128xi1>, vector<16x128xf32>
    %129 = vector.extract_strided_slice %27 {offsets = [4, 0], sizes = [1, 128], strides = [1, 1]} : vector<37x128xf32> to vector<1x128xf32>
    %130 = vector.broadcast %129 : vector<1x128xf32> to vector<16x128xf32>
    %131 = arith.mulf %26, %130 : vector<16x128xf32>
    %132 = vector.extract_strided_slice %27 {offsets = [13, 0], sizes = [1, 128], strides = [1, 1]} : vector<37x128xf32> to vector<1x128xf32>
    %133 = vector.broadcast %132 : vector<1x128xf32> to vector<16x128xf32>
    %134 = arith.mulf %29, %133 : vector<16x128xf32>
    %135 = arith.addf %131, %134 : vector<16x128xf32>
    %136 = vector.extract_strided_slice %27 {offsets = [22, 0], sizes = [1, 128], strides = [1, 1]} : vector<37x128xf32> to vector<1x128xf32>
    %137 = vector.broadcast %136 : vector<1x128xf32> to vector<16x128xf32>
    %138 = arith.mulf %30, %137 : vector<16x128xf32>
    %139 = arith.addf %135, %138 : vector<16x128xf32>
    %140 = vector.extract_strided_slice %27 {offsets = [31, 0], sizes = [1, 128], strides = [1, 1]} : vector<37x128xf32> to vector<1x128xf32>
    %141 = vector.broadcast %140 : vector<1x128xf32> to vector<16x128xf32>
    %142 = arith.mulf %31, %141 : vector<16x128xf32>
    %143 = arith.addf %139, %142 : vector<16x128xf32>
    %144 = arith.addf %108, %143 : vector<16x128xf32>
    %145 = arith.addf %144, %128 : vector<16x128xf32>
    %146 = vector.extract_strided_slice %27 {offsets = [6, 0], sizes = [1, 128], strides = [1, 1]} : vector<37x128xf32> to vector<1x128xf32>
    %147 = vector.broadcast %146 : vector<1x128xf32> to vector<16x128xf32>
    %148 = arith.mulf %26, %147 : vector<16x128xf32>
    %149 = vector.extract_strided_slice %27 {offsets = [15, 0], sizes = [1, 128], strides = [1, 1]} : vector<37x128xf32> to vector<1x128xf32>
    %150 = vector.broadcast %149 : vector<1x128xf32> to vector<16x128xf32>
    %151 = arith.mulf %29, %150 : vector<16x128xf32>
    %152 = arith.addf %148, %151 : vector<16x128xf32>
    %153 = vector.extract_strided_slice %27 {offsets = [24, 0], sizes = [1, 128], strides = [1, 1]} : vector<37x128xf32> to vector<1x128xf32>
    %154 = vector.broadcast %153 : vector<1x128xf32> to vector<16x128xf32>
    %155 = arith.mulf %30, %154 : vector<16x128xf32>
    %156 = arith.addf %152, %155 : vector<16x128xf32>
    %157 = vector.extract_strided_slice %27 {offsets = [33, 0], sizes = [1, 128], strides = [1, 1]} : vector<37x128xf32> to vector<1x128xf32>
    %158 = vector.broadcast %157 : vector<1x128xf32> to vector<16x128xf32>
    %159 = arith.mulf %31, %158 : vector<16x128xf32>
    %160 = arith.addf %156, %159 : vector<16x128xf32>
    %c1_i32_15 = arith.constant 1 : i32
    %161 = tpu.dynamic_rotate %160 by %c1_i32_15 dim 1 : vector<16x128xf32>, i32 -> vector<16x128xf32>
    %cst_16 = arith.constant 0.000000e+00 : f32
    %162 = vector.shape_cast %18 : vector<1x128xi1> to vector<1x128xi1>
    %163 = vector.broadcast %162 : vector<1x128xi1> to vector<16x128xi1>
    %164 = vector.broadcast %cst_16 : f32 to vector<16x128xf32>
    %165 = arith.select %163, %161, %164 : vector<16x128xi1>, vector<16x128xf32>
    %166 = vector.extract_strided_slice %27 {offsets = [8, 0], sizes = [1, 128], strides = [1, 1]} : vector<37x128xf32> to vector<1x128xf32>
    %167 = vector.broadcast %166 : vector<1x128xf32> to vector<16x128xf32>
    %168 = arith.mulf %26, %167 : vector<16x128xf32>
    %169 = vector.extract_strided_slice %27 {offsets = [17, 0], sizes = [1, 128], strides = [1, 1]} : vector<37x128xf32> to vector<1x128xf32>
    %170 = vector.broadcast %169 : vector<1x128xf32> to vector<16x128xf32>
    %171 = arith.mulf %29, %170 : vector<16x128xf32>
    %172 = arith.addf %168, %171 : vector<16x128xf32>
    %173 = vector.extract_strided_slice %27 {offsets = [26, 0], sizes = [1, 128], strides = [1, 1]} : vector<37x128xf32> to vector<1x128xf32>
    %174 = vector.broadcast %173 : vector<1x128xf32> to vector<16x128xf32>
    %175 = arith.mulf %30, %174 : vector<16x128xf32>
    %176 = arith.addf %172, %175 : vector<16x128xf32>
    %177 = vector.extract_strided_slice %27 {offsets = [35, 0], sizes = [1, 128], strides = [1, 1]} : vector<37x128xf32> to vector<1x128xf32>
    %178 = vector.broadcast %177 : vector<1x128xf32> to vector<16x128xf32>
    %179 = arith.mulf %31, %178 : vector<16x128xf32>
    %180 = arith.addf %176, %179 : vector<16x128xf32>
    %c127_i32_17 = arith.constant 127 : i32
    %181 = tpu.dynamic_rotate %180 by %c127_i32_17 dim 1 : vector<16x128xf32>, i32 -> vector<16x128xf32>
    %cst_18 = arith.constant 0.000000e+00 : f32
    %182 = vector.shape_cast %20 : vector<1x128xi1> to vector<1x128xi1>
    %183 = vector.broadcast %182 : vector<1x128xi1> to vector<16x128xi1>
    %184 = vector.broadcast %cst_18 : f32 to vector<16x128xf32>
    %185 = arith.select %183, %181, %184 : vector<16x128xi1>, vector<16x128xf32>
    %186 = vector.extract_strided_slice %27 {offsets = [7, 0], sizes = [1, 128], strides = [1, 1]} : vector<37x128xf32> to vector<1x128xf32>
    %187 = vector.broadcast %186 : vector<1x128xf32> to vector<16x128xf32>
    %188 = arith.mulf %26, %187 : vector<16x128xf32>
    %189 = vector.extract_strided_slice %27 {offsets = [16, 0], sizes = [1, 128], strides = [1, 1]} : vector<37x128xf32> to vector<1x128xf32>
    %190 = vector.broadcast %189 : vector<1x128xf32> to vector<16x128xf32>
    %191 = arith.mulf %29, %190 : vector<16x128xf32>
    %192 = arith.addf %188, %191 : vector<16x128xf32>
    %193 = vector.extract_strided_slice %27 {offsets = [25, 0], sizes = [1, 128], strides = [1, 1]} : vector<37x128xf32> to vector<1x128xf32>
    %194 = vector.broadcast %193 : vector<1x128xf32> to vector<16x128xf32>
    %195 = arith.mulf %30, %194 : vector<16x128xf32>
    %196 = arith.addf %192, %195 : vector<16x128xf32>
    %197 = vector.extract_strided_slice %27 {offsets = [34, 0], sizes = [1, 128], strides = [1, 1]} : vector<37x128xf32> to vector<1x128xf32>
    %198 = vector.broadcast %197 : vector<1x128xf32> to vector<16x128xf32>
    %199 = arith.mulf %31, %198 : vector<16x128xf32>
    %200 = arith.addf %196, %199 : vector<16x128xf32>
    %201 = arith.addf %165, %200 : vector<16x128xf32>
    %202 = arith.addf %201, %185 : vector<16x128xf32>
    %c1_i32_19 = arith.constant 1 : i32
    %203 = tpu.dynamic_rotate %88 by %c1_i32_19 dim 0 : vector<16x128xf32>, i32 -> vector<16x128xf32>
    %cst_20 = arith.constant 0.000000e+00 : f32
    %204 = vector.shape_cast %23 : vector<16x1xi1> to vector<16x1xi1>
    %205 = vector.broadcast %204 : vector<16x1xi1> to vector<16x128xi1>
    %206 = vector.broadcast %cst_20 : f32 to vector<16x128xf32>
    %207 = arith.select %205, %203, %206 : vector<16x128xi1>, vector<16x128xf32>
    %c15_i32_21 = arith.constant 15 : i32
    %208 = tpu.dynamic_rotate %202 by %c15_i32_21 dim 0 : vector<16x128xf32>, i32 -> vector<16x128xf32>
    %cst_22 = arith.constant 0.000000e+00 : f32
    %209 = vector.shape_cast %25 : vector<16x1xi1> to vector<16x1xi1>
    %210 = vector.broadcast %209 : vector<16x1xi1> to vector<16x128xi1>
    %211 = vector.broadcast %cst_22 : f32 to vector<16x128xf32>
    %212 = arith.select %210, %208, %211 : vector<16x128xi1>, vector<16x128xf32>
    %213 = vector.broadcast %28 : vector<1x128xf32> to vector<16x128xf32>
    %214 = arith.addf %213, %145 : vector<16x128xf32>
    %215 = arith.addf %214, %207 : vector<16x128xf32>
    %216 = arith.addf %215, %212 : vector<16x128xf32>
    %cst_23 = arith.constant 0.000000e+00 : f32
    %217 = vector.broadcast %cst_23 : f32 to vector<16x128xf32>
    %218 = arith.maximumf %216, %217 : vector<16x128xf32>
    %c0_24 = arith.constant 0 : index
    %c0_25 = arith.constant 0 : index
    %219 = vector.load %arg2[%c0_24, %c0_25] : memref<37x128xf32, #tpu.memory_space<vmem>>, vector<37x128xf32>
    %220 = vector.extract_strided_slice %219 {offsets = [36, 0], sizes = [1, 128], strides = [1, 1]} : vector<37x128xf32> to vector<1x128xf32>
    %c96_i32_26 = arith.constant 96 : i32
    %221 = tpu.dynamic_rotate %218 by %c96_i32_26 dim 1 : vector<16x128xf32>, i32 -> vector<16x128xf32>
    %c64_i32_27 = arith.constant 64 : i32
    %222 = tpu.dynamic_rotate %218 by %c64_i32_27 dim 1 : vector<16x128xf32>, i32 -> vector<16x128xf32>
    %c32_i32_28 = arith.constant 32 : i32
    %223 = tpu.dynamic_rotate %218 by %c32_i32_28 dim 1 : vector<16x128xf32>, i32 -> vector<16x128xf32>
    %224 = vector.extract_strided_slice %219 {offsets = [0, 0], sizes = [1, 128], strides = [1, 1]} : vector<37x128xf32> to vector<1x128xf32>
    %225 = vector.broadcast %224 : vector<1x128xf32> to vector<16x128xf32>
    %226 = arith.mulf %218, %225 : vector<16x128xf32>
    %227 = vector.extract_strided_slice %219 {offsets = [9, 0], sizes = [1, 128], strides = [1, 1]} : vector<37x128xf32> to vector<1x128xf32>
    %228 = vector.broadcast %227 : vector<1x128xf32> to vector<16x128xf32>
    %229 = arith.mulf %221, %228 : vector<16x128xf32>
    %230 = arith.addf %226, %229 : vector<16x128xf32>
    %231 = vector.extract_strided_slice %219 {offsets = [18, 0], sizes = [1, 128], strides = [1, 1]} : vector<37x128xf32> to vector<1x128xf32>
    %232 = vector.broadcast %231 : vector<1x128xf32> to vector<16x128xf32>
    %233 = arith.mulf %222, %232 : vector<16x128xf32>
    %234 = arith.addf %230, %233 : vector<16x128xf32>
    %235 = vector.extract_strided_slice %219 {offsets = [27, 0], sizes = [1, 128], strides = [1, 1]} : vector<37x128xf32> to vector<1x128xf32>
    %236 = vector.broadcast %235 : vector<1x128xf32> to vector<16x128xf32>
    %237 = arith.mulf %223, %236 : vector<16x128xf32>
    %238 = arith.addf %234, %237 : vector<16x128xf32>
    %c1_i32_29 = arith.constant 1 : i32
    %239 = tpu.dynamic_rotate %238 by %c1_i32_29 dim 1 : vector<16x128xf32>, i32 -> vector<16x128xf32>
    %cst_30 = arith.constant 0.000000e+00 : f32
    %240 = vector.shape_cast %18 : vector<1x128xi1> to vector<1x128xi1>
    %241 = vector.broadcast %240 : vector<1x128xi1> to vector<16x128xi1>
    %242 = vector.broadcast %cst_30 : f32 to vector<16x128xf32>
    %243 = arith.select %241, %239, %242 : vector<16x128xi1>, vector<16x128xf32>
    %244 = vector.extract_strided_slice %219 {offsets = [2, 0], sizes = [1, 128], strides = [1, 1]} : vector<37x128xf32> to vector<1x128xf32>
    %245 = vector.broadcast %244 : vector<1x128xf32> to vector<16x128xf32>
    %246 = arith.mulf %218, %245 : vector<16x128xf32>
    %247 = vector.extract_strided_slice %219 {offsets = [11, 0], sizes = [1, 128], strides = [1, 1]} : vector<37x128xf32> to vector<1x128xf32>
    %248 = vector.broadcast %247 : vector<1x128xf32> to vector<16x128xf32>
    %249 = arith.mulf %221, %248 : vector<16x128xf32>
    %250 = arith.addf %246, %249 : vector<16x128xf32>
    %251 = vector.extract_strided_slice %219 {offsets = [20, 0], sizes = [1, 128], strides = [1, 1]} : vector<37x128xf32> to vector<1x128xf32>
    %252 = vector.broadcast %251 : vector<1x128xf32> to vector<16x128xf32>
    %253 = arith.mulf %222, %252 : vector<16x128xf32>
    %254 = arith.addf %250, %253 : vector<16x128xf32>
    %255 = vector.extract_strided_slice %219 {offsets = [29, 0], sizes = [1, 128], strides = [1, 1]} : vector<37x128xf32> to vector<1x128xf32>
    %256 = vector.broadcast %255 : vector<1x128xf32> to vector<16x128xf32>
    %257 = arith.mulf %223, %256 : vector<16x128xf32>
    %258 = arith.addf %254, %257 : vector<16x128xf32>
    %c127_i32_31 = arith.constant 127 : i32
    %259 = tpu.dynamic_rotate %258 by %c127_i32_31 dim 1 : vector<16x128xf32>, i32 -> vector<16x128xf32>
    %cst_32 = arith.constant 0.000000e+00 : f32
    %260 = vector.shape_cast %20 : vector<1x128xi1> to vector<1x128xi1>
    %261 = vector.broadcast %260 : vector<1x128xi1> to vector<16x128xi1>
    %262 = vector.broadcast %cst_32 : f32 to vector<16x128xf32>
    %263 = arith.select %261, %259, %262 : vector<16x128xi1>, vector<16x128xf32>
    %264 = vector.extract_strided_slice %219 {offsets = [1, 0], sizes = [1, 128], strides = [1, 1]} : vector<37x128xf32> to vector<1x128xf32>
    %265 = vector.broadcast %264 : vector<1x128xf32> to vector<16x128xf32>
    %266 = arith.mulf %218, %265 : vector<16x128xf32>
    %267 = vector.extract_strided_slice %219 {offsets = [10, 0], sizes = [1, 128], strides = [1, 1]} : vector<37x128xf32> to vector<1x128xf32>
    %268 = vector.broadcast %267 : vector<1x128xf32> to vector<16x128xf32>
    %269 = arith.mulf %221, %268 : vector<16x128xf32>
    %270 = arith.addf %266, %269 : vector<16x128xf32>
    %271 = vector.extract_strided_slice %219 {offsets = [19, 0], sizes = [1, 128], strides = [1, 1]} : vector<37x128xf32> to vector<1x128xf32>
    %272 = vector.broadcast %271 : vector<1x128xf32> to vector<16x128xf32>
    %273 = arith.mulf %222, %272 : vector<16x128xf32>
    %274 = arith.addf %270, %273 : vector<16x128xf32>
    %275 = vector.extract_strided_slice %219 {offsets = [28, 0], sizes = [1, 128], strides = [1, 1]} : vector<37x128xf32> to vector<1x128xf32>
    %276 = vector.broadcast %275 : vector<1x128xf32> to vector<16x128xf32>
    %277 = arith.mulf %223, %276 : vector<16x128xf32>
    %278 = arith.addf %274, %277 : vector<16x128xf32>
    %279 = arith.addf %243, %278 : vector<16x128xf32>
    %280 = arith.addf %279, %263 : vector<16x128xf32>
    %281 = vector.extract_strided_slice %219 {offsets = [3, 0], sizes = [1, 128], strides = [1, 1]} : vector<37x128xf32> to vector<1x128xf32>
    %282 = vector.broadcast %281 : vector<1x128xf32> to vector<16x128xf32>
    %283 = arith.mulf %218, %282 : vector<16x128xf32>
    %284 = vector.extract_strided_slice %219 {offsets = [12, 0], sizes = [1, 128], strides = [1, 1]} : vector<37x128xf32> to vector<1x128xf32>
    %285 = vector.broadcast %284 : vector<1x128xf32> to vector<16x128xf32>
    %286 = arith.mulf %221, %285 : vector<16x128xf32>
    %287 = arith.addf %283, %286 : vector<16x128xf32>
    %288 = vector.extract_strided_slice %219 {offsets = [21, 0], sizes = [1, 128], strides = [1, 1]} : vector<37x128xf32> to vector<1x128xf32>
    %289 = vector.broadcast %288 : vector<1x128xf32> to vector<16x128xf32>
    %290 = arith.mulf %222, %289 : vector<16x128xf32>
    %291 = arith.addf %287, %290 : vector<16x128xf32>
    %292 = vector.extract_strided_slice %219 {offsets = [30, 0], sizes = [1, 128], strides = [1, 1]} : vector<37x128xf32> to vector<1x128xf32>
    %293 = vector.broadcast %292 : vector<1x128xf32> to vector<16x128xf32>
    %294 = arith.mulf %223, %293 : vector<16x128xf32>
    %295 = arith.addf %291, %294 : vector<16x128xf32>
    %c1_i32_33 = arith.constant 1 : i32
    %296 = tpu.dynamic_rotate %295 by %c1_i32_33 dim 1 : vector<16x128xf32>, i32 -> vector<16x128xf32>
    %cst_34 = arith.constant 0.000000e+00 : f32
    %297 = vector.shape_cast %18 : vector<1x128xi1> to vector<1x128xi1>
    %298 = vector.broadcast %297 : vector<1x128xi1> to vector<16x128xi1>
    %299 = vector.broadcast %cst_34 : f32 to vector<16x128xf32>
    %300 = arith.select %298, %296, %299 : vector<16x128xi1>, vector<16x128xf32>
    %301 = vector.extract_strided_slice %219 {offsets = [5, 0], sizes = [1, 128], strides = [1, 1]} : vector<37x128xf32> to vector<1x128xf32>
    %302 = vector.broadcast %301 : vector<1x128xf32> to vector<16x128xf32>
    %303 = arith.mulf %218, %302 : vector<16x128xf32>
    %304 = vector.extract_strided_slice %219 {offsets = [14, 0], sizes = [1, 128], strides = [1, 1]} : vector<37x128xf32> to vector<1x128xf32>
    %305 = vector.broadcast %304 : vector<1x128xf32> to vector<16x128xf32>
    %306 = arith.mulf %221, %305 : vector<16x128xf32>
    %307 = arith.addf %303, %306 : vector<16x128xf32>
    %308 = vector.extract_strided_slice %219 {offsets = [23, 0], sizes = [1, 128], strides = [1, 1]} : vector<37x128xf32> to vector<1x128xf32>
    %309 = vector.broadcast %308 : vector<1x128xf32> to vector<16x128xf32>
    %310 = arith.mulf %222, %309 : vector<16x128xf32>
    %311 = arith.addf %307, %310 : vector<16x128xf32>
    %312 = vector.extract_strided_slice %219 {offsets = [32, 0], sizes = [1, 128], strides = [1, 1]} : vector<37x128xf32> to vector<1x128xf32>
    %313 = vector.broadcast %312 : vector<1x128xf32> to vector<16x128xf32>
    %314 = arith.mulf %223, %313 : vector<16x128xf32>
    %315 = arith.addf %311, %314 : vector<16x128xf32>
    %c127_i32_35 = arith.constant 127 : i32
    %316 = tpu.dynamic_rotate %315 by %c127_i32_35 dim 1 : vector<16x128xf32>, i32 -> vector<16x128xf32>
    %cst_36 = arith.constant 0.000000e+00 : f32
    %317 = vector.shape_cast %20 : vector<1x128xi1> to vector<1x128xi1>
    %318 = vector.broadcast %317 : vector<1x128xi1> to vector<16x128xi1>
    %319 = vector.broadcast %cst_36 : f32 to vector<16x128xf32>
    %320 = arith.select %318, %316, %319 : vector<16x128xi1>, vector<16x128xf32>
    %321 = vector.extract_strided_slice %219 {offsets = [4, 0], sizes = [1, 128], strides = [1, 1]} : vector<37x128xf32> to vector<1x128xf32>
    %322 = vector.broadcast %321 : vector<1x128xf32> to vector<16x128xf32>
    %323 = arith.mulf %218, %322 : vector<16x128xf32>
    %324 = vector.extract_strided_slice %219 {offsets = [13, 0], sizes = [1, 128], strides = [1, 1]} : vector<37x128xf32> to vector<1x128xf32>
    %325 = vector.broadcast %324 : vector<1x128xf32> to vector<16x128xf32>
    %326 = arith.mulf %221, %325 : vector<16x128xf32>
    %327 = arith.addf %323, %326 : vector<16x128xf32>
    %328 = vector.extract_strided_slice %219 {offsets = [22, 0], sizes = [1, 128], strides = [1, 1]} : vector<37x128xf32> to vector<1x128xf32>
    %329 = vector.broadcast %328 : vector<1x128xf32> to vector<16x128xf32>
    %330 = arith.mulf %222, %329 : vector<16x128xf32>
    %331 = arith.addf %327, %330 : vector<16x128xf32>
    %332 = vector.extract_strided_slice %219 {offsets = [31, 0], sizes = [1, 128], strides = [1, 1]} : vector<37x128xf32> to vector<1x128xf32>
    %333 = vector.broadcast %332 : vector<1x128xf32> to vector<16x128xf32>
    %334 = arith.mulf %223, %333 : vector<16x128xf32>
    %335 = arith.addf %331, %334 : vector<16x128xf32>
    %336 = arith.addf %300, %335 : vector<16x128xf32>
    %337 = arith.addf %336, %320 : vector<16x128xf32>
    %338 = vector.extract_strided_slice %219 {offsets = [6, 0], sizes = [1, 128], strides = [1, 1]} : vector<37x128xf32> to vector<1x128xf32>
    %339 = vector.broadcast %338 : vector<1x128xf32> to vector<16x128xf32>
    %340 = arith.mulf %218, %339 : vector<16x128xf32>
    %341 = vector.extract_strided_slice %219 {offsets = [15, 0], sizes = [1, 128], strides = [1, 1]} : vector<37x128xf32> to vector<1x128xf32>
    %342 = vector.broadcast %341 : vector<1x128xf32> to vector<16x128xf32>
    %343 = arith.mulf %221, %342 : vector<16x128xf32>
    %344 = arith.addf %340, %343 : vector<16x128xf32>
    %345 = vector.extract_strided_slice %219 {offsets = [24, 0], sizes = [1, 128], strides = [1, 1]} : vector<37x128xf32> to vector<1x128xf32>
    %346 = vector.broadcast %345 : vector<1x128xf32> to vector<16x128xf32>
    %347 = arith.mulf %222, %346 : vector<16x128xf32>
    %348 = arith.addf %344, %347 : vector<16x128xf32>
    %349 = vector.extract_strided_slice %219 {offsets = [33, 0], sizes = [1, 128], strides = [1, 1]} : vector<37x128xf32> to vector<1x128xf32>
    %350 = vector.broadcast %349 : vector<1x128xf32> to vector<16x128xf32>
    %351 = arith.mulf %223, %350 : vector<16x128xf32>
    %352 = arith.addf %348, %351 : vector<16x128xf32>
    %c1_i32_37 = arith.constant 1 : i32
    %353 = tpu.dynamic_rotate %352 by %c1_i32_37 dim 1 : vector<16x128xf32>, i32 -> vector<16x128xf32>
    %cst_38 = arith.constant 0.000000e+00 : f32
    %354 = vector.shape_cast %18 : vector<1x128xi1> to vector<1x128xi1>
    %355 = vector.broadcast %354 : vector<1x128xi1> to vector<16x128xi1>
    %356 = vector.broadcast %cst_38 : f32 to vector<16x128xf32>
    %357 = arith.select %355, %353, %356 : vector<16x128xi1>, vector<16x128xf32>
    %358 = vector.extract_strided_slice %219 {offsets = [8, 0], sizes = [1, 128], strides = [1, 1]} : vector<37x128xf32> to vector<1x128xf32>
    %359 = vector.broadcast %358 : vector<1x128xf32> to vector<16x128xf32>
    %360 = arith.mulf %218, %359 : vector<16x128xf32>
    %361 = vector.extract_strided_slice %219 {offsets = [17, 0], sizes = [1, 128], strides = [1, 1]} : vector<37x128xf32> to vector<1x128xf32>
    %362 = vector.broadcast %361 : vector<1x128xf32> to vector<16x128xf32>
    %363 = arith.mulf %221, %362 : vector<16x128xf32>
    %364 = arith.addf %360, %363 : vector<16x128xf32>
    %365 = vector.extract_strided_slice %219 {offsets = [26, 0], sizes = [1, 128], strides = [1, 1]} : vector<37x128xf32> to vector<1x128xf32>
    %366 = vector.broadcast %365 : vector<1x128xf32> to vector<16x128xf32>
    %367 = arith.mulf %222, %366 : vector<16x128xf32>
    %368 = arith.addf %364, %367 : vector<16x128xf32>
    %369 = vector.extract_strided_slice %219 {offsets = [35, 0], sizes = [1, 128], strides = [1, 1]} : vector<37x128xf32> to vector<1x128xf32>
    %370 = vector.broadcast %369 : vector<1x128xf32> to vector<16x128xf32>
    %371 = arith.mulf %223, %370 : vector<16x128xf32>
    %372 = arith.addf %368, %371 : vector<16x128xf32>
    %c127_i32_39 = arith.constant 127 : i32
    %373 = tpu.dynamic_rotate %372 by %c127_i32_39 dim 1 : vector<16x128xf32>, i32 -> vector<16x128xf32>
    %cst_40 = arith.constant 0.000000e+00 : f32
    %374 = vector.shape_cast %20 : vector<1x128xi1> to vector<1x128xi1>
    %375 = vector.broadcast %374 : vector<1x128xi1> to vector<16x128xi1>
    %376 = vector.broadcast %cst_40 : f32 to vector<16x128xf32>
    %377 = arith.select %375, %373, %376 : vector<16x128xi1>, vector<16x128xf32>
    %378 = vector.extract_strided_slice %219 {offsets = [7, 0], sizes = [1, 128], strides = [1, 1]} : vector<37x128xf32> to vector<1x128xf32>
    %379 = vector.broadcast %378 : vector<1x128xf32> to vector<16x128xf32>
    %380 = arith.mulf %218, %379 : vector<16x128xf32>
    %381 = vector.extract_strided_slice %219 {offsets = [16, 0], sizes = [1, 128], strides = [1, 1]} : vector<37x128xf32> to vector<1x128xf32>
    %382 = vector.broadcast %381 : vector<1x128xf32> to vector<16x128xf32>
    %383 = arith.mulf %221, %382 : vector<16x128xf32>
    %384 = arith.addf %380, %383 : vector<16x128xf32>
    %385 = vector.extract_strided_slice %219 {offsets = [25, 0], sizes = [1, 128], strides = [1, 1]} : vector<37x128xf32> to vector<1x128xf32>
    %386 = vector.broadcast %385 : vector<1x128xf32> to vector<16x128xf32>
    %387 = arith.mulf %222, %386 : vector<16x128xf32>
    %388 = arith.addf %384, %387 : vector<16x128xf32>
    %389 = vector.extract_strided_slice %219 {offsets = [34, 0], sizes = [1, 128], strides = [1, 1]} : vector<37x128xf32> to vector<1x128xf32>
    %390 = vector.broadcast %389 : vector<1x128xf32> to vector<16x128xf32>
    %391 = arith.mulf %223, %390 : vector<16x128xf32>
    %392 = arith.addf %388, %391 : vector<16x128xf32>
    %393 = arith.addf %357, %392 : vector<16x128xf32>
    %394 = arith.addf %393, %377 : vector<16x128xf32>
    %c1_i32_41 = arith.constant 1 : i32
    %395 = tpu.dynamic_rotate %280 by %c1_i32_41 dim 0 : vector<16x128xf32>, i32 -> vector<16x128xf32>
    %cst_42 = arith.constant 0.000000e+00 : f32
    %396 = vector.shape_cast %23 : vector<16x1xi1> to vector<16x1xi1>
    %397 = vector.broadcast %396 : vector<16x1xi1> to vector<16x128xi1>
    %398 = vector.broadcast %cst_42 : f32 to vector<16x128xf32>
    %399 = arith.select %397, %395, %398 : vector<16x128xi1>, vector<16x128xf32>
    %c15_i32_43 = arith.constant 15 : i32
    %400 = tpu.dynamic_rotate %394 by %c15_i32_43 dim 0 : vector<16x128xf32>, i32 -> vector<16x128xf32>
    %cst_44 = arith.constant 0.000000e+00 : f32
    %401 = vector.shape_cast %25 : vector<16x1xi1> to vector<16x1xi1>
    %402 = vector.broadcast %401 : vector<16x1xi1> to vector<16x128xi1>
    %403 = vector.broadcast %cst_44 : f32 to vector<16x128xf32>
    %404 = arith.select %402, %400, %403 : vector<16x128xi1>, vector<16x128xf32>
    %405 = vector.broadcast %220 : vector<1x128xf32> to vector<16x128xf32>
    %406 = arith.addf %405, %337 : vector<16x128xf32>
    %407 = arith.addf %406, %399 : vector<16x128xf32>
    %408 = arith.addf %407, %404 : vector<16x128xf32>
    %cst_45 = arith.constant 0.000000e+00 : f32
    %409 = vector.broadcast %cst_45 : f32 to vector<16x128xf32>
    %410 = arith.maximumf %408, %409 : vector<16x128xf32>
    %c0_46 = arith.constant 0 : index
    %c0_47 = arith.constant 0 : index
    %411 = vector.load %arg3[%c0_46, %c0_47] : memref<16x128xf32, #tpu.memory_space<vmem>>, vector<16x128xf32>
    tpu.vector_store %arg3[%c0_46, %c0_47], %410 {strides = array<i32>} : memref<16x128xf32, #tpu.memory_space<vmem>>, vector<16x128xf32>,
    return
  }
}

</mosaic_0001>

<bundles_post_ra>
// kernel: step_layer_pallas.1
= control target key start
LH: loop header
LB: loop body
LE: loop exit
PB: predicated region body
PF: predicated region fallthrough
CT: control target
= control target key end

     0   :  { %s782_s14 = smov 64   ;;  %s783_s15 = smov 96   ;;  %v1458_v2 = vlaneseq  ;;  %s1454_s0 = inlined_call_operand.vmem [shape: f32[16,128], index: 0, kind: input, shape index: {}]   ;;  %s1455_s1 = inlined_call_operand.vmem [shape: f32[37,128], index: 1, kind: input, shape index: {}]   ;;  %s1456_s2 = inlined_call_operand.vmem [shape: f32[37,128], index: 2, kind: input, shape index: {}]   ;;  %s1457_s3 = inlined_call_operand.vmem [shape: f32[16,128], index: 3, kind: output, shape index: {}]  }
   0x1   :  { %v810_v0 = vld [vmem:[%s1454_s0] sm:$0xff]  ;;  %v819_v1 = vld [vmem:[%s1454_s0 + $0x8] sm:$0xff]  ;;  %s784_s18 = smov 32   ;;  %v41_v21 = vld [vmem:[%s1455_s1 + $0x10] sm:$0xff]  ;;  %s786_s28 = smov 127  }
   0x2   :  { %48 = vrot.lane.b32.xlu1 %v810_v0, %s782_s14  ;;  %44 = vrot.lane.b32.xlu0 %v810_v0, %s783_s15  ;;  %v826_v3 = vshrl.u32 %v1458_v2, 7  ;;  %v39_v5 = vld [vmem:[%s1455_s1] sm:$0xff]  ;;  %v40_v20 = vld [vmem:[%s1455_s1 + $0x8] sm:$0xff] }
   0x3   :  { %v42_v26 = vld [vmem:[%s1455_s1 + $0x18] sm:$0xff]  ;;  %v912_v37 = vld [vmem:[%s1455_s1 + $0x20] sm:$0x1f]  ;;  %s785_s1 = smov 1  }
   0x4   :  { %1488 = vst [vmem:[#allocation2_spill] sm:$0xff] %v826_v3  ;;  %v833_v4 = vsub.s32 1, %v826_v3  ;;  %v839_v6 = vsub.s32 4, %v826_v3  ;;  %v842_v7 = vsub.s32 7, %v826_v3  ;;  %v866_v17 = vsub.s32 0, %v826_v3  ;;  %1500 = vst [vmem:[#allocation14_spill] sm:$0xff] %v912_v37 }
   0x5   :  { %v869_v18 = vsub.s32 2, %v826_v3  ;;  %v872_v19 = vsub.s32 3, %v826_v3  ;;  %v882_v23 = vsub.s32 6, %v826_v3  ;;  %v886_v25 = vsub.s32 5, %v826_v3 }
   0x6   :  { %50 = vrot.lane.b32.xlu1 %v819_v1, %s782_s14  ;;  %46 = vrot.lane.b32.xlu0 %v819_v1, %s783_s15  ;;  %1489 = vst [vmem:[#allocation3_spill] sm:$0xff] %v833_v4  ;;  %1490 = vst [vmem:[#allocation4_spill] sm:$0xff] %v839_v6  ;;  %v135_v8 = vrot.slane %v39_v5, %v833_v4  ;;  %v241_v9 = vrot.slane %v39_v5, %v839_v6 }
   0x7   :  { %1491 = vst [vmem:[#allocation5_spill] sm:$0xff] %v842_v7  ;;  %v347_v14 = vrot.slane %v39_v5, %v842_v7  ;;  %1495 = vst [vmem:[#allocation9_spill] sm:$0xff] %v866_v17  ;;  %v59_v22 = vrot.slane %v39_v5, %v866_v17  ;;  %v97_v24 = vrot.slane %v39_v5, %v869_v18 }
   0x8   :  { %v847_v10 = vmul.f32 %v135_v8, %v819_v1  ;;  %v850_v11 = vmul.f32 %v135_v8, %v810_v0  ;;  %v853_v12 = vmul.f32 %v241_v9, %v819_v1  ;;  %v856_v13 = vmul.f32 %v241_v9, %v810_v0  ;;  %1496 = vst [vmem:[#allocation10_spill] sm:$0xff] %v869_v18 }
   0x9   :  { %v860_v15 = vmul.f32 %v347_v14, %v819_v1  ;;  %v863_v16 = vmul.f32 %v347_v14, %v810_v0  ;;  %1497 = vst [vmem:[#allocation11_spill] sm:$0xff] %v872_v19  ;;  %1498 = vst [vmem:[#allocation12_spill] sm:$0xff] %v882_v23  ;;  %v65_v27 = vrot.slane %v40_v20, %v833_v4 }
   0xa   :  { %54 = vrot.lane.b32.xlu1 %v819_v1, %s784_s18  ;;  %52 = vrot.lane.b32.xlu0 %v810_v0, %s784_s18  ;;  %1492 = vst [vmem:[#allocation6_spill] sm:$0xff] %v856_v13  ;;  %1499 = vst [vmem:[#allocation13_spill] sm:$0xff] %v886_v25  ;;  %v893_v28 = vrot.slane %v41_v21, %v869_v18  ;;  %v169_v29 = vrot.slane %v39_v5, %v872_v19 }
   0xb   :  { %1493 = vst [vmem:[#allocation7_spill] sm:$0xff] %v860_v15  ;;  %1494 = vst [vmem:[#allocation8_spill] sm:$0xff] %v863_v16  ;;  %v61_v30 = vmul.f32 %v59_v22, %v819_v1  ;;  %v898_v31 = vrot.slane %v42_v26, %v872_v19  ;;  %v103_v32 = vrot.slane %v40_v20, %v872_v19 }
   0xc   :  { %v902_v33 = vrot.slane %v41_v21, %v839_v6  ;;  %v60_v34 = vmul.f32 %v59_v22, %v810_v0  ;;  %v99_v35 = vmul.f32 %v97_v24, %v819_v1  ;;  %v907_v36 = vrot.slane %v42_v26, %v886_v25 }
   0xd   :  { %v275_v38 = vrot.slane %v39_v5, %v882_v23  ;;  %v98_v39 = vmul.f32 %v97_v24, %v810_v0  ;;  %v175_v40 = vrot.slane %v40_v20, %v839_v6  ;;  %v918_v41 = vrot.slane %v41_v21, %v886_v25 }
   0xe   :  { %v205_v42 = vrot.slane %v39_v5, %v886_v25  ;;  %v171_v43 = vmul.f32 %v169_v29, %v819_v1  ;;  %v923_v44 = vrot.slane %v42_v26, %v882_v23  ;;  %v170_v45 = vmul.f32 %v169_v29, %v810_v0 }
   0xf   :  { %v311_v46 = vrot.slane %v40_v20, %v866_v17  ;;  %v281_v47 = vrot.slane %v40_v20, %v842_v7  ;;  %v289_v48 = vrot.slane %v42_v26, %v866_v17  ;;  %v931_v49 = vrot.slane %v912_v37, %v833_v4 }
  0x10   :  { %v211_v50 = vrot.slane %v40_v20, %v882_v23  ;;  %v277_v51 = vmul.f32 %v275_v38, %v819_v1  ;;  %v276_v52 = vmul.f32 %v275_v38, %v810_v0  ;;  %v937_v53 = vrot.slane %v41_v21, %v842_v7 }
  0x11   :  { %v941_v54 = vrot.slane %v912_v37, %v866_v17  ;;  %v944_v55 = vmul.f32 %v205_v42, %v819_v1  ;;  %v947_v56 = vmul.f32 %v205_v42, %v810_v0  ;;  %v950_v57 = vrot.slane %v41_v21, %v833_v4 }
  0x12   :  { %v953_v58 = vrot.slane %v42_v26, %v869_v18  ;;  %v960_v61 = vmul.f32 %v311_v46, %v819_v1  ;;  %v964_v62 = vrot.slane %v912_v37, %v872_v19  ;;  %v967_v63 = vmul.f32 %v311_v46, %v810_v0 }
  0x13   :  { %v970_v5 = vrot.slane %v40_v20, %v869_v18  ;;  %v975_v14 = vrot.slane %v41_v21, %v872_v19  ;;  %v978_v1 = vrot.slane %v42_v26, %v839_v6  ;;  %v983_v0 = vrot.slane %v40_v20, %v886_v25 }
  0x14   :  { %v986_v29 = vrot.slane %v41_v21, %v882_v23  ;;  %v991_v42 = vrot.slane %v42_v26, %v842_v7  ;;  %v994_v46 = vrot.slane %v41_v21, %v866_v17  ;;  %v997_v2 = vrot.slane %v42_v26, %v833_v4 }
  0x74   :  { %v955_v59 = vpop.permute.xlu1 %48  ;;  %v957_v60 = vpop.permute.xlu0 %44 }
  0x75   :  { %v66_v8 = vmul.f32 %v65_v27, %v957_v60  ;;  %v104_v9 = vmul.f32 %v103_v32, %v957_v60  ;;  %v176_v22 = vmul.f32 %v175_v40, %v957_v60  ;;  %v282_v24 = vmul.f32 %v281_v47, %v957_v60 }
  0x76   :  { %v74_v38 = vmul.f32 %v893_v28, %v955_v59  ;;  %v112_v25 = vmul.f32 %v902_v33, %v955_v59  ;;  %v184_v23 = vmul.f32 %v918_v41, %v955_v59  ;;  %v290_v7 = vmul.f32 %v289_v48, %v955_v59 }
  0x77   :  { %v68_v20 = vadd.f32 %v66_v8, %v60_v34  ;;  %v106_v17 = vadd.f32 %v104_v9, %v98_v39  ;;  %v212_v26 = vmul.f32 %v211_v50, %v957_v60  ;;  %v178_v18 = vadd.f32 %v176_v22, %v170_v45 }
  0x78   :  { %v999_v19 = vpop.permute.xlu1 %50  ;;  %v1001_v6 = vpop.permute.xlu0 %46  ;;  %v284_v3 = vadd.f32 %v282_v24, %v276_v52  ;;  %v220_v34 = vmul.f32 %v937_v53, %v955_v59  ;;  %v318_v52 = vmul.f32 %v950_v57, %v957_v60 }
  0x79   :  { %v67_v37 = vmul.f32 %v65_v27, %v1001_v6  ;;  %v105_v21 = vmul.f32 %v103_v32, %v1001_v6  ;;  %v177_v4 = vmul.f32 %v175_v40, %v1001_v6  ;;  %v75_v16 = vmul.f32 %v893_v28, %v999_v19 }
  0x7a   :  { %v283_v13 = vmul.f32 %v281_v47, %v1001_v6  ;;  %v76_v39 = vadd.f32 %v74_v38, %v68_v20  ;;  %v113_v40 = vmul.f32 %v902_v33, %v999_v19  ;;  %v291_v33 = vmul.f32 %v289_v48, %v999_v19 }
  0x7b   :  { %v69_v8 = vadd.f32 %v67_v37, %v61_v30  ;;  %v107_v15 = vadd.f32 %v105_v21, %v99_v35  ;;  %v179_v45 = vadd.f32 %v177_v4, %v171_v43  ;;  %v185_v35 = vmul.f32 %v918_v41, %v999_v19 }
  0x7c   :  { %v1017_v27 = vpop.permute.xlu1 %54  ;;  %v1019_v32 = vpop.permute.xlu0 %52  ;;  %v213_v4 = vmul.f32 %v211_v50, %v1001_v6  ;;  %v285_v24 = vadd.f32 %v283_v13, %v277_v51  ;;  %v114_v38 = vadd.f32 %v112_v25, %v106_v17  ;;  %v186_v17 = vadd.f32 %v184_v23, %v178_v18 }
  0x7d   :  { %v77_v9 = vadd.f32 %v75_v16, %v69_v8  ;;  %v83_v30 = vmul.f32 %v898_v31, %v1017_v27  ;;  %v82_v28 = vmul.f32 %v898_v31, %v1019_v32  ;;  %v115_v37 = vadd.f32 %v113_v40, %v107_v15 }
  0x7e   :  { %v121_v47 = vmul.f32 %v907_v36, %v1017_v27  ;;  %v120_v16 = vmul.f32 %v907_v36, %v1019_v32  ;;  %v187_v20 = vadd.f32 %v185_v35, %v179_v45  ;;  %v193_v31 = vmul.f32 %v923_v44, %v1017_v27 }
  0x7f   :  { %v85_v43 = vadd.f32 %v83_v30, %v77_v9  ;;  %v84_v22 = vadd.f32 %v82_v28, %v76_v39  ;;  %v192_v15 = vmul.f32 %v923_v44, %v1019_v32  ;;  %v293_v41 = vadd.f32 %v291_v33, %v285_v24 }
  0x80   :  { %v299_v48 = vmul.f32 %v931_v49, %v1017_v27  ;;  %v298_v13 = vmul.f32 %v931_v49, %v1019_v32  ;;  %v215_v25 = vadd.f32 %v213_v4, %v944_v55  ;;  %v214_v36 = vadd.f32 %v212_v26, %v947_v56 }
  0x81   :  { %88 = vrot.lane.b32.xlu1 %v85_v43, %s785_s1  ;;  %86 = vrot.lane.b32.xlu0 %v84_v22, %s785_s1  ;;  %v326_v44 = vmul.f32 %v953_v58, %v955_v59  ;;  %v123_v50 = vadd.f32 %v121_v47, %v115_v37  ;;  %v122_v51 = vadd.f32 %v120_v16, %v114_v38  ;;  %v1501_v22 = vld [vmem:[#allocation6_spill] sm:$0xff] }
  0x82   :  { %v292_v21 = vadd.f32 %v290_v7, %v284_v3  ;;  %v319_v8 = vmul.f32 %v950_v57, %v1001_v6  ;;  %v195_v39 = vadd.f32 %v193_v31, %v187_v20  ;;  %v194_v40 = vadd.f32 %v192_v15, %v186_v17 }
  0x83   :  { %v221_v45 = vmul.f32 %v937_v53, %v999_v19  ;;  %v229_v18 = vmul.f32 %v941_v54, %v1017_v27  ;;  %v301_v23 = vadd.f32 %v299_v48, %v293_v41  ;;  %v228_v3 = vmul.f32 %v941_v54, %v1019_v32 }
  0x84   :  { %v300_v49 = vadd.f32 %v298_v13, %v292_v21  ;;  %v222_v55 = vadd.f32 %v220_v34, %v214_v36  ;;  %v143_v56 = vmul.f32 %v970_v5, %v1001_v6  ;;  %v151_v53 = vmul.f32 %v975_v14, %v999_v19  ;;  %v1503_v13 = vld [vmem:[#allocation8_spill] sm:$0xff] }
  0x85   :  { %126 = vrot.lane.b32.xlu1 %v123_v50, %s786_s28  ;;  %124 = vrot.lane.b32.xlu0 %v122_v51, %s786_s28  ;;  %v223_v7 = vadd.f32 %v221_v45, %v215_v25  ;;  %v321_v57 = vadd.f32 %v319_v8, %v960_v61  ;;  %v327_v26 = vmul.f32 %v953_v58, %v999_v19 }
  0x86   :  { %v335_v9 = vmul.f32 %v964_v62, %v1017_v27  ;;  %v142_v30 = vmul.f32 %v970_v5, %v957_v60  ;;  %v145_v54 = vadd.f32 %v143_v56, %v847_v10  ;;  %v159_v34 = vmul.f32 %v978_v1, %v1017_v27 }
  0x87   :  { %v150_v28 = vmul.f32 %v975_v14, %v955_v59  ;;  %v249_v61 = vmul.f32 %v983_v0, %v1001_v6  ;;  %v320_v58 = vadd.f32 %v318_v52, %v967_v63  ;;  %v158_v10 = vmul.f32 %v978_v1, %v1019_v32 }
  0x88   :  { %v144_v35 = vadd.f32 %v142_v30, %v850_v11  ;;  %v153_v5 = vadd.f32 %v151_v53, %v145_v54  ;;  %v257_v14 = vmul.f32 %v986_v29, %v999_v19  ;;  %v265_v47 = vmul.f32 %v991_v42, %v1017_v27  ;;  %v1511_v53 = vld [vmem:[#allocation2_spill] sm:$0xff] }
  0x89   :  { %198 = vrot.lane.b32.xlu1 %v195_v39, %s785_s1  ;;  %196 = vrot.lane.b32.xlu0 %v194_v40, %s785_s1  ;;  %v251_v37 = vadd.f32 %v249_v61, %v853_v12  ;;  %v334_v33 = vmul.f32 %v964_v62, %v1019_v32  ;;  %v248_v63 = vmul.f32 %v983_v0, %v957_v60  ;;  %v1508_v40 = vmov 0 }
  0x8a   :  { %v152_v4 = vadd.f32 %v150_v28, %v144_v35  ;;  %v256_v11 = vmul.f32 %v986_v29, %v955_v59  ;;  %v161_v1 = vadd.f32 %v159_v34, %v153_v5  ;;  %v355_v12 = vmul.f32 %v994_v46, %v1001_v6  ;;  %v1502_v29 = vld [vmem:[#allocation7_spill] sm:$0xff]  ;;  %v1512_v34 = vld [vmem:[#allocation10_spill] sm:$0xff] }
  0x8b   :  { %v259_v52 = vadd.f32 %v257_v14, %v251_v37  ;;  %v363_v43 = vmul.f32 %v997_v2, %v999_v19  ;;  %v250_v16 = vadd.f32 %v248_v63, %v1501_v22  ;;  %v264_v0 = vmul.f32 %v991_v42, %v1019_v32  ;;  %v1513_v28 = vld [vmem:[#allocation14_spill] sm:$0xff]  ;;  %v1514_v63 = vld [vmem:[#allocation4_spill] sm:$0xff] }
  0x8c   :  { %v160_v62 = vadd.f32 %v158_v10, %v152_v4  ;;  %v357_v38 = vadd.f32 %v355_v12, %v1502_v29  ;;  %v354_v20 = vmul.f32 %v994_v46, %v957_v60  ;;  %v362_v6 = vmul.f32 %v997_v2, %v955_v59 }
  0x8d   :  { %304 = vrot.lane.b32.xlu1 %v301_v23, %s785_s1  ;;  %302 = vrot.lane.b32.xlu0 %v300_v49, %s785_s1  ;;  %v267_v24 = vadd.f32 %v265_v47, %v259_v52  ;;  %v231_v19 = vadd.f32 %v229_v18, %v223_v7  ;;  %v230_v31 = vadd.f32 %v228_v3, %v222_v55  ;;  %v1504_v2 = vlaneseq }
  0x8e   :  { %v329_v15 = vadd.f32 %v327_v26, %v321_v57  ;;  %v258_v41 = vadd.f32 %v256_v11, %v250_v16  ;;  %v365_v48 = vadd.f32 %v363_v43, %v357_v38  ;;  %v356_v17 = vadd.f32 %v354_v20, %v1503_v13 }
  0x8f   :  { %v328_v42 = vadd.f32 %v326_v44, %v320_v58  ;;  %v15_v59 = vand.u32 127, %v1504_v2  ;;  %v1505_v46 = vmov 0  ;;  %vm380_vm2 = vcmp.lt.s32.totalorder %v1511_v53, 1 }
  0x90   :  { %v266_v25 = vadd.f32 %v264_v0, %v258_v41  ;;  %v364_v36 = vadd.f32 %v362_v6, %v356_v17  ;;  %v337_v50 = vadd.f32 %v335_v9, %v329_v15  ;;  %v369_v61 = vrot.slane %v1513_v28, %v1512_v34 }
  0x91   :  { %234 = vrot.lane.b32.xlu1 %v231_v19, %s786_s28  ;;  %232 = vrot.lane.b32.xlu0 %v230_v31, %s786_s28  ;;  %v336_v51 = vadd.f32 %v334_v33, %v328_v42  ;;  %v20_v60 = vand.u32 15, %v15_v59  ;;  %v403_v11 = vrot.slane %v1513_v28, %v1514_v63  ;;  %vm33_vm3 = vcmp.gt.s32.totalorder %v1511_v53, 0 }
  0x92   :  { %v371_v14 = vmul.f32 %v369_v61, %v1017_v27  ;;  %v370_v47 = vmul.f32 %v369_v61, %v1019_v32  ;;  %vm391_vm4 = vcmp.lt.s32.totalorder %v1511_v53, 7 }
  0x93   :  { %vm1116_vm0 = vcmp.gt.s32.totalorder %v20_v60, 0  ;;  %vm1124_vm1 = vcmp.lt.s32.totalorder %v20_v60, 15 }
  0x94   :  { %v1506_v46 = vsel %vm1116_vm0, 4294967295, %v1505_v46  ;;  %v1509_v40 = vsel %vm1124_vm1, 4294967295, %v1508_v40  ;;  %v372_v22 = vadd.f32 %v370_v47, %v364_v36 }
  0x95   :  { %340 = vrot.lane.b32.xlu1 %v337_v50, %s786_s28  ;;  %338 = vrot.lane.b32.xlu0 %v336_v51, %s786_s28  ;;  %1507 = vst [vmem:[#allocation6_spill] sm:$0xff] %v1506_v46  ;;  %1510 = vst [vmem:[#allocation7_spill] sm:$0xff] %v1509_v40 }
  0xf3   :  { %v89_v21 = vpop.permute.xlu1 %88  ;;  %v87_v8 = vpop.permute.xlu0 %86 }
  0xf4   :  { %v93_v44 = vsel %vm1116_vm0, %v89_v21, 0.0  ;;  %v92_v39 = vsel %vm1116_vm0, %v87_v8, 0.0  ;;  %v412_v21 = vld [vmem:[%s1456_s2] sm:$0xff] }
  0xf5   :  { %v163_v45 = vadd.f32 %v161_v1, %v93_v44  ;;  %v162_v18 = vadd.f32 %v160_v62, %v92_v39  ;;  %v373_v62 = vadd.f32 %v371_v14, %v365_v48  ;;  %v468_v61 = vrot.slane %v412_v21, %v1512_v34  ;;  %v1210_v14 = vld [vmem:[%s1456_s2 + $0x18] sm:$0xff] }
  0xf7   :  { %v127_v23 = vpop.permute.xlu1 %126  ;;  %v125_v49 = vpop.permute.xlu0 %124 }
  0xf8   :  { %v131_v3 = vsel %vm1124_vm1, %v127_v23, 0.0  ;;  %v130_v7 = vsel %vm1124_vm1, %v125_v49, 0.0  ;;  %v610_v23 = vrot.slane %v412_v21, %v1514_v63  ;;  %v1517_v49 = vld [vmem:[#allocation5_spill] sm:$0xff] }
  0xf9   :  { %v165_v55 = vadd.f32 %v163_v45, %v131_v3  ;;  %v164_v56 = vadd.f32 %v162_v18, %v130_v7  ;;  %v1516_v45 = vld [vmem:[#allocation3_spill] sm:$0xff]  ;;  %v716_v3 = vrot.slane %v412_v21, %v1517_v49 }
  0xfa   :  { %v504_v18 = vrot.slane %v412_v21, %v1516_v45 }
  0xfb   :  { %v379_v57 = vrot.slane %v165_v55, 7  ;;  %v378_v26 = vrot.slane %v164_v56, 7  ;;  %v199_v9 = vpop.permute.xlu1 %198  ;;  %v197_v30 = vpop.permute.xlu0 %196 }
  0xfc   :  { %v201_v5 = vsel %vm1116_vm0, %v199_v9, 0.0  ;;  %v200_v37 = vsel %vm1116_vm0, %v197_v30, 0.0  ;;  %v413_v30 = vld [vmem:[%s1456_s2 + $0x8] sm:$0xff] }
  0xfd   :  { %v382_v54 = vsel %vm380_vm2, %v379_v57, %v378_v26  ;;  %v381_v58 = vsel %vm380_vm2, %v378_v26, %v379_v57  ;;  %v269_v33 = vadd.f32 %v267_v24, %v201_v5  ;;  %v268_v4 = vadd.f32 %v266_v25, %v200_v37  ;;  %v1522_v5 = vld [vmem:[#allocation12_spill] sm:$0xff] }
  0xfe   :  { %v1157_v24 = vadd.s32 8, %v1511_v53  ;;  %v387_v15 = vsel %vm33_vm3, %v382_v54, 0.0  ;;  %v1520_v54 = vld [vmem:[#allocation9_spill] sm:$0xff]  ;;  %v644_v37 = vrot.slane %v412_v21, %v1522_v5  ;;  %v438_v47 = vrot.slane %v413_v30, %v1516_v45 }
  0xff   :  { %v305_v35 = vpop.permute.xlu1 %304  ;;  %v303_v10 = vpop.permute.xlu0 %302  ;;  %v432_v28 = vrot.slane %v412_v21, %v1520_v54 }
 0x100   :  { %v307_v12 = vsel %vm1116_vm0, %v305_v35, 0.0  ;;  %v306_v43 = vsel %vm1116_vm0, %v303_v10, 0.0  ;;  %1515 = vst [vmem:[#allocation8_spill] sm:$0xff] %v1157_v24  ;;  %vm36_vm5 = vcmp.lt.s32.totalorder %v1157_v24, 15  ;;  %v1521_v35 = vld [vmem:[#allocation11_spill] sm:$0xff] }
 0x101   :  { %v375_v29 = vadd.f32 %v373_v62, %v307_v12  ;;  %v374_v38 = vadd.f32 %v372_v22, %v306_v43  ;;  %v538_v10 = vrot.slane %v412_v21, %v1521_v35  ;;  %v1218_v12 = vrot.slane %v1210_v14, %v1521_v35 }
 0x103   :  { %v235_v1 = vpop.permute.xlu1 %234  ;;  %v233_v52 = vpop.permute.xlu0 %232 }
 0x104   :  { %v237_v27 = vsel %vm1124_vm1, %v235_v1, 0.0  ;;  %v236_v32 = vsel %vm1124_vm1, %v233_v52, 0.0  ;;  %v680_v1 = vrot.slane %v413_v30, %v1520_v54 }
 0x105   :  { %v271_v16 = vadd.f32 %v269_v33, %v237_v27  ;;  %v270_v0 = vadd.f32 %v268_v4, %v236_v32  ;;  %v1523_v4 = vld [vmem:[#allocation13_spill] sm:$0xff]  ;;  %v474_v27 = vrot.slane %v413_v30, %v1521_v35 }
 0x106   :  { %v1224_v22 = vrot.slane %v1210_v14, %v1523_v4 }
 0x107   :  { %v405_v20 = vadd.f32 %v403_v11, %v271_v16  ;;  %v404_v6 = vadd.f32 %v403_v11, %v270_v0  ;;  %v341_v19 = vpop.permute.xlu1 %340  ;;  %v339_v31 = vpop.permute.xlu0 %338  ;;  %v574_v11 = vrot.slane %v412_v21, %v1523_v4  ;;  %v1260_v21 = vrot.slane %v413_v30, %v1512_v34 }
 0x108   :  { %v343_v41 = vsel %vm1124_vm1, %v341_v19, 0.0  ;;  %v342_v48 = vsel %vm1124_vm1, %v339_v31, 0.0  ;;  %v544_v19 = vrot.slane %v413_v30, %v1514_v63  ;;  %v650_v31 = vrot.slane %v413_v30, %v1517_v49 }
 0x109   :  { %v407_v13 = vadd.f32 %v405_v20, %v381_v58  ;;  %v406_v17 = vadd.f32 %v404_v6, %v387_v15  ;;  %v377_v42 = vadd.f32 %v375_v29, %v343_v41  ;;  %v376_v25 = vadd.f32 %v374_v38, %v342_v48  ;;  %v414_v58 = vld [vmem:[%s1456_s2 + $0x10] sm:$0xff]  ;;  %v1229_v38 = vld [vmem:[%s1456_s2 + $0x20] sm:$0x1f] }
 0x10a   :  { %v446_v33 = vrot.slane %v414_v58, %v1512_v34  ;;  %v482_v62 = vrot.slane %v414_v58, %v1514_v63  ;;  %1524 = vst [vmem:[#allocation3_spill] sm:$0xff] %v1229_v38  ;;  %v552_v48 = vrot.slane %v414_v58, %v1523_v4  ;;  %v1299_v24 = vrot.slane %v1229_v38, %v1521_v35 }
 0x10b   :  { %v390_v36 = vrot.slane %v377_v42, 1  ;;  %v389_v50 = vrot.slane %v376_v25, 1 }
 0x10d   :  { %v392_v51 = vsel %vm391_vm4, %v389_v50, %v390_v36  ;;  %v393_v2 = vsel %vm391_vm4, %v390_v36, %v389_v50  ;;  %v658_v36 = vrot.slane %v1210_v14, %v1520_v54  ;;  %v666_v50 = vrot.slane %v1229_v38, %v1516_v45 }
 0x10e   :  { %v399_v59 = vsel %vm36_vm5, %v393_v2, 0.0  ;;  %v408_v60 = vadd.f32 %v406_v17, %v392_v51  ;;  %v1251_v51 = vrot.slane %v413_v30, %v1522_v5  ;;  %v1254_v2 = vrot.slane %v414_v58, %v1516_v45 }
 0x10f   :  { %v409_v8 = vadd.f32 %v407_v13, %v399_v59  ;;  %v560_v13 = vrot.slane %v1210_v14, %v1522_v5 }
 0x110   :  { %v410_v44 = vmax.f32 %v408_v60, 0.0 }
 0x111   :  { %v411_v39 = vmax.f32 %v409_v8, 0.0  ;;  %v1263_v8 = vrot.slane %v413_v30, %v1523_v4  ;;  %v1279_v30 = vrot.slane %v1229_v38, %v1520_v54 }
 0x112   :  { %417 = vrot.lane.b32.xlu0 %v410_v44, %s783_s15  ;;  %v1181_v7 = vmul.f32 %v504_v18, %v410_v44  ;;  %v1187_v56 = vmul.f32 %v610_v23, %v410_v44  ;;  %v1191_v26 = vmul.f32 %v716_v3, %v410_v44  ;;  %v433_v52 = vmul.f32 %v432_v28, %v410_v44 }
 0x113   :  { %419 = vrot.lane.b32.xlu1 %v411_v39, %s783_s15  ;;  %v1184_v55 = vmul.f32 %v504_v18, %v411_v39  ;;  %v1189_v57 = vmul.f32 %v610_v23, %v411_v39  ;;  %v1193_v9 = vmul.f32 %v716_v3, %v411_v39  ;;  %v469_v43 = vmul.f32 %v468_v61, %v410_v44 }
 0x114   :  { %1518 = vst [vmem:[#allocation14_spill] sm:$0xff] %v1191_v26  ;;  %v434_v32 = vmul.f32 %v432_v28, %v411_v39  ;;  %v470_v16 = vmul.f32 %v468_v61, %v411_v39  ;;  %v539_v0 = vmul.f32 %v538_v10, %v410_v44  ;;  %v540_v29 = vmul.f32 %v538_v10, %v411_v39 }
 0x115   :  { %1519 = vst [vmem:[#allocation4_spill] sm:$0xff] %v1193_v9  ;;  %v645_v20 = vmul.f32 %v644_v37, %v410_v44  ;;  %v646_v6 = vmul.f32 %v644_v37, %v411_v39  ;;  %v1233_v15 = vmul.f32 %v574_v11, %v410_v44  ;;  %v1235_v41 = vmul.f32 %v574_v11, %v411_v39 }
 0x116   :  { %421 = vrot.lane.b32.xlu0 %v410_v44, %s782_s14  ;;  %v1240_v17 = vmul.f32 %v680_v1, %v410_v44  ;;  %v1242_v42 = vmul.f32 %v680_v1, %v411_v39  ;;  %v1272_v3 = vrot.slane %v414_v58, %v1517_v49  ;;  %v1286_v11 = vrot.slane %v1210_v14, %v1512_v34 }
 0x117   :  { %423 = vrot.lane.b32.xlu1 %v411_v39, %s782_s14  ;;  %v1289_v1 = vrot.slane %v414_v58, %v1521_v35 }
 0x118   :  { %1525 = vst [vmem:[#allocation5_spill] sm:$0xff] %v1242_v42 }
 0x11a   :  { %425 = vrot.lane.b32.xlu0 %v410_v44, %s784_s18  ;;  %v1266_v44 = vrot.slane %v414_v58, %v1520_v54 }
 0x11b   :  { %427 = vrot.lane.b32.xlu1 %v411_v39, %s784_s18 }
 0x184   :  { %v1244_v25 = vpop.permute.xlu0 %417 }
 0x185   :  { %v1256_v59 = vpop.permute.xlu1 %419  ;;  %v439_v60 = vmul.f32 %v438_v47, %v1244_v25  ;;  %v475_v39 = vmul.f32 %v474_v27, %v1244_v25  ;;  %v545_v18 = vmul.f32 %v544_v19, %v1244_v25  ;;  %v651_v23 = vmul.f32 %v650_v31, %v1244_v25 }
 0x186   :  { %v440_v28 = vmul.f32 %v438_v47, %v1256_v59  ;;  %v476_v61 = vmul.f32 %v474_v27, %v1256_v59  ;;  %v546_v10 = vmul.f32 %v544_v19, %v1256_v59  ;;  %v652_v4 = vmul.f32 %v650_v31, %v1256_v59 }
 0x187   :  { %v1292_v47 = vrot.slane %v414_v58, %v1522_v5  ;;  %v441_v19 = vadd.f32 %v439_v60, %v433_v52  ;;  %v1303_v31 = vrot.slane %v1210_v14, %v1516_v45  ;;  %v477_v34 = vadd.f32 %v475_v39, %v469_v43 }
 0x188   :  { %v1281_v37 = vpop.permute.xlu0 %421  ;;  %v547_v40 = vadd.f32 %v545_v18, %v539_v0  ;;  %v653_v46 = vadd.f32 %v651_v23, %v645_v20  ;;  %v442_v58 = vadd.f32 %v440_v28, %v434_v32  ;;  %v478_v42 = vadd.f32 %v476_v61, %v470_v16 }
 0x189   :  { %v1294_v27 = vpop.permute.xlu1 %423  ;;  %v447_v54 = vmul.f32 %v446_v33, %v1281_v37  ;;  %v483_v5 = vmul.f32 %v482_v62, %v1281_v37  ;;  %v548_v52 = vadd.f32 %v546_v10, %v540_v29  ;;  %v553_v35 = vmul.f32 %v552_v48, %v1281_v37 }
 0x18a   :  { %v448_v53 = vmul.f32 %v446_v33, %v1294_v27  ;;  %v484_v9 = vmul.f32 %v482_v62, %v1294_v27  ;;  %v659_v38 = vmul.f32 %v658_v36, %v1281_v37  ;;  %v654_v45 = vadd.f32 %v652_v4, %v646_v6 }
 0x18b   :  { %v449_v33 = vadd.f32 %v447_v54, %v441_v19  ;;  %v554_v32 = vmul.f32 %v552_v48, %v1294_v27  ;;  %v660_v16 = vmul.f32 %v658_v36, %v1294_v27  ;;  %v485_v39 = vadd.f32 %v483_v5, %v477_v34 }
 0x18c   :  { %v1307_v60 = vpop.permute.xlu0 %425  ;;  %v450_v0 = vadd.f32 %v448_v53, %v442_v58  ;;  %v555_v48 = vadd.f32 %v553_v35, %v547_v40  ;;  %v661_v61 = vadd.f32 %v659_v38, %v653_v46  ;;  %v526_v10 = vrot.slane %v1210_v14, %v1514_v63 }
 0x18d   :  { %v1312_v26 = vpop.permute.xlu1 %427  ;;  %v455_v43 = vmul.f32 %v1218_v12, %v1307_v60  ;;  %v491_v62 = vmul.f32 %v1224_v22, %v1307_v60  ;;  %v561_v20 = vmul.f32 %v560_v13, %v1307_v60  ;;  %v667_v23 = vmul.f32 %v666_v50, %v1307_v60 }
 0x18e   :  { %v456_v29 = vmul.f32 %v1218_v12, %v1312_v26  ;;  %v492_v18 = vmul.f32 %v1224_v22, %v1312_v26  ;;  %v562_v36 = vmul.f32 %v560_v13, %v1312_v26  ;;  %v668_v53 = vmul.f32 %v666_v50, %v1312_v26 }
 0x18f   :  { %v457_v6 = vadd.f32 %v455_v43, %v449_v33  ;;  %v486_v12 = vadd.f32 %v484_v9, %v478_v42  ;;  %v632_v34 = vrot.slane %v1210_v14, %v1517_v49  ;;  %v493_v22 = vadd.f32 %v491_v62, %v485_v39 }
 0x190   :  { %v458_v28 = vadd.f32 %v456_v29, %v450_v0  ;;  %v563_v4 = vadd.f32 %v561_v20, %v555_v48  ;;  %v556_v19 = vadd.f32 %v554_v32, %v548_v52  ;;  %v662_v40 = vadd.f32 %v660_v16, %v654_v45 }
 0x191   :  { %459 = vrot.lane.b32.xlu0 %v457_v6, %s785_s1  ;;  %v494_v54 = vadd.f32 %v492_v18, %v486_v12  ;;  %v669_v13 = vadd.f32 %v667_v23, %v661_v61  ;;  %v581_v50 = vmul.f32 %v1251_v51, %v1244_v25  ;;  %v582_v46 = vmul.f32 %v1251_v51, %v1256_v59  ;;  %v1527_v61 = vld [vmem:[#allocation4_spill] sm:$0xff] }
 0x192   :  { %461 = vrot.lane.b32.xlu1 %v458_v28, %s785_s1  ;;  %v564_v9 = vadd.f32 %v562_v36, %v556_v19  ;;  %v670_v38 = vadd.f32 %v668_v53, %v662_v40  ;;  %v589_v42 = vmul.f32 %v1272_v3, %v1281_v37  ;;  %v511_v49 = vmul.f32 %v1260_v21, %v1244_v25  ;;  %v1526_v36 = vld [vmem:[#allocation14_spill] sm:$0xff]  ;;  %v1528_v19 = vld [vmem:[#allocation5_spill] sm:$0xff] }
 0x193   :  { %v597_v14 = vmul.f32 %v1279_v30, %v1307_v60  ;;  %v590_v58 = vmul.f32 %v1272_v3, %v1294_v27  ;;  %v687_v5 = vmul.f32 %v1254_v2, %v1244_v25  ;;  %v519_v51 = vmul.f32 %v1289_v1, %v1281_v37 }
 0x194   :  { %v598_v52 = vmul.f32 %v1279_v30, %v1312_v26  ;;  %v513_v35 = vadd.f32 %v511_v49, %v1181_v7  ;;  %v527_v45 = vmul.f32 %v526_v10, %v1307_v60  ;;  %v512_v33 = vmul.f32 %v1260_v21, %v1256_v59 }
 0x195   :  { %495 = vrot.lane.b32.xlu0 %v493_v22, %s786_s28  ;;  %v583_v3 = vadd.f32 %v581_v50, %v1233_v15  ;;  %v584_v43 = vadd.f32 %v582_v46, %v1235_v41  ;;  %v695_v32 = vmul.f32 %v1286_v11, %v1281_v37  ;;  %v520_v16 = vmul.f32 %v1289_v1, %v1294_v27 }
 0x196   :  { %497 = vrot.lane.b32.xlu1 %v494_v54, %s786_s28  ;;  %v703_v30 = vmul.f32 %v1299_v24, %v1307_v60  ;;  %v521_v0 = vadd.f32 %v519_v51, %v513_v35  ;;  %v514_v7 = vadd.f32 %v512_v33, %v1184_v55  ;;  %v528_v29 = vmul.f32 %v526_v10, %v1312_v26 }
 0x197   :  { %v689_v15 = vadd.f32 %v687_v5, %v1240_v17  ;;  %v688_v41 = vmul.f32 %v1254_v2, %v1256_v59  ;;  %v617_v21 = vmul.f32 %v1263_v8, %v1244_v25  ;;  %v625_v1 = vmul.f32 %v1292_v47, %v1281_v37 }
 0x198   :  { %v529_v62 = vadd.f32 %v527_v45, %v521_v0  ;;  %v522_v20 = vadd.f32 %v520_v16, %v514_v7  ;;  %v618_v55 = vmul.f32 %v1263_v8, %v1256_v59  ;;  %v626_v6 = vmul.f32 %v1292_v47, %v1294_v27  ;;  %v1532_v0 = vld [vmem:[#allocation3_spill] sm:$0xff] }
 0x199   :  { %565 = vrot.lane.b32.xlu0 %v563_v4, %s785_s1  ;;  %v619_v17 = vadd.f32 %v617_v21, %v1187_v56  ;;  %v633_v2 = vmul.f32 %v632_v34, %v1307_v60  ;;  %v723_v39 = vmul.f32 %v1266_v44, %v1244_v25  ;;  %v731_v18 = vmul.f32 %v1303_v31, %v1281_v37 }
 0x19a   :  { %567 = vrot.lane.b32.xlu1 %v564_v9, %s785_s1  ;;  %v530_v23 = vadd.f32 %v528_v29, %v522_v20  ;;  %v620_v28 = vadd.f32 %v618_v55, %v1189_v57  ;;  %v634_v48 = vmul.f32 %v632_v34, %v1312_v26  ;;  %v724_v8 = vmul.f32 %v1266_v44, %v1256_v59 }
 0x19b   :  { %v591_v47 = vadd.f32 %v589_v42, %v583_v3  ;;  %v627_v56 = vadd.f32 %v625_v1, %v619_v17  ;;  %v725_v53 = vadd.f32 %v723_v39, %v1526_v36  ;;  %v732_v25 = vmul.f32 %v1303_v31, %v1294_v27 }
 0x19c   :  { %v592_v37 = vadd.f32 %v590_v58, %v584_v43  ;;  %v696_v57 = vmul.f32 %v1286_v11, %v1294_v27  ;;  %v628_v12 = vadd.f32 %v626_v6, %v620_v28  ;;  %v726_v10 = vadd.f32 %v724_v8, %v1527_v61 }
 0x19d   :  { %671 = vrot.lane.b32.xlu0 %v669_v13, %s785_s1  ;;  %v599_v34 = vadd.f32 %v597_v14, %v591_v47  ;;  %v704_v59 = vmul.f32 %v1299_v24, %v1312_v26  ;;  %v635_v44 = vadd.f32 %v633_v2, %v627_v56  ;;  %v733_v22 = vadd.f32 %v731_v18, %v725_v53 }
 0x19e   :  { %673 = vrot.lane.b32.xlu1 %v670_v38, %s785_s1  ;;  %v600_v4 = vadd.f32 %v598_v52, %v592_v37  ;;  %v690_v40 = vadd.f32 %v688_v41, %v1528_v19  ;;  %v636_v54 = vadd.f32 %v634_v48, %v628_v12  ;;  %v734_v31 = vadd.f32 %v732_v25, %v726_v10 }
 0x19f   :  { %v697_v13 = vadd.f32 %v695_v32, %v689_v15  ;;  %v762_v2 = vrot.slane %v1532_v0, %v1514_v63 }
 0x1a0   :  { %v698_v11 = vadd.f32 %v696_v57, %v690_v40 }
 0x1a1   :  { %601 = vrot.lane.b32.xlu0 %v599_v34, %s786_s28  ;;  %v705_v27 = vadd.f32 %v703_v30, %v697_v13  ;;  %v1531_v30 = vld [vmem:[#allocation10_spill] sm:$0xff] }
 0x1a2   :  { %603 = vrot.lane.b32.xlu1 %v600_v4, %s786_s28  ;;  %v706_v50 = vadd.f32 %v704_v59, %v698_v11  ;;  %v738_v7 = vrot.slane %v1532_v0, %v1531_v30 }
 0x1a4   :  { %v739_v55 = vmul.f32 %v738_v7, %v1307_v60  ;;  %v740_v6 = vmul.f32 %v738_v7, %v1312_v26 }
 0x1a5   :  { %707 = vrot.lane.b32.xlu0 %v705_v27, %s786_s28 }
 0x1a6   :  { %709 = vrot.lane.b32.xlu1 %v706_v50, %s786_s28  ;;  %v741_v8 = vadd.f32 %v739_v55, %v733_v22  ;;  %v742_v56 = vadd.f32 %v740_v6, %v734_v31 }
 0x203   :  { %v460_v24 = vpop.permute.xlu0 %459 }
 0x204   :  { %v463_v9 = vsel %vm1116_vm0, %v460_v24, 0.0  ;;  %v462_v38 = vpop.permute.xlu1 %461 }
 0x205   :  { %v464_v42 = vsel %vm1116_vm0, %v462_v38, 0.0  ;;  %v531_v49 = vadd.f32 %v529_v62, %v463_v9 }
 0x206   :  { %v532_v58 = vadd.f32 %v530_v23, %v464_v42 }
 0x207   :  { %v496_v14 = vpop.permute.xlu0 %495 }
 0x208   :  { %v499_v51 = vsel %vm1124_vm1, %v496_v14, 0.0  ;;  %v498_v52 = vpop.permute.xlu1 %497 }
 0x209   :  { %v533_v35 = vadd.f32 %v531_v49, %v499_v51  ;;  %v500_v45 = vsel %vm1124_vm1, %v498_v52, 0.0 }
 0x20a   :  { %v534_v33 = vadd.f32 %v532_v58, %v500_v45 }
 0x20b   :  { %v747_v3 = vrot.slane %v533_v35, 7  ;;  %v566_v43 = vpop.permute.xlu0 %565 }
 0x20c   :  { %v748_v32 = vrot.slane %v534_v33, 7  ;;  %v568_v16 = vpop.permute.xlu1 %567  ;;  %v569_v1 = vsel %vm1116_vm0, %v566_v43, 0.0 }
 0x20d   :  { %v570_v20 = vsel %vm1116_vm0, %v568_v16, 0.0  ;;  %v637_v17 = vadd.f32 %v635_v44, %v569_v1 }
 0x20e   :  { %v750_v15 = vsel %vm380_vm2, %v748_v32, %v747_v3  ;;  %v749_v41 = vsel %vm380_vm2, %v747_v3, %v748_v32  ;;  %v638_v18 = vadd.f32 %v636_v54, %v570_v20 }
 0x20f   :  { %v672_v21 = vpop.permute.xlu0 %671  ;;  %v751_v57 = vsel %vm33_vm3, %v750_v15, 0.0 }
 0x210   :  { %v674_v62 = vpop.permute.xlu1 %673  ;;  %v675_v23 = vsel %vm1116_vm0, %v672_v21, 0.0 }
 0x211   :  { %v676_v47 = vsel %vm1116_vm0, %v674_v62, 0.0  ;;  %v743_v63 = vadd.f32 %v741_v8, %v675_v23 }
 0x212   :  { %v744_v37 = vadd.f32 %v742_v56, %v676_v47 }
 0x213   :  { %v602_v39 = vpop.permute.xlu0 %601 }
 0x214   :  { %v605_v28 = vsel %vm1124_vm1, %v602_v39, 0.0  ;;  %v604_v48 = vpop.permute.xlu1 %603 }
 0x215   :  { %v639_v60 = vadd.f32 %v637_v17, %v605_v28  ;;  %v606_v26 = vsel %vm1124_vm1, %v604_v48, 0.0 }
 0x216   :  { %v640_v36 = vadd.f32 %v638_v18, %v606_v26 }
 0x217   :  { %v763_v53 = vadd.f32 %v762_v2, %v639_v60  ;;  %v708_v25 = vpop.permute.xlu0 %707 }
 0x218   :  { %v764_v12 = vadd.f32 %v762_v2, %v640_v36  ;;  %v711_v61 = vsel %vm1124_vm1, %v708_v25, 0.0  ;;  %v710_v10 = vpop.permute.xlu1 %709 }
 0x219   :  { %v765_v34 = vadd.f32 %v763_v53, %v751_v57  ;;  %v745_v59 = vadd.f32 %v743_v63, %v711_v61  ;;  %v712_v44 = vsel %vm1124_vm1, %v710_v10, 0.0 }
 0x21a   :  { %v766_v22 = vadd.f32 %v764_v12, %v749_v41  ;;  %v746_v4 = vadd.f32 %v744_v37, %v712_v44 }
 0x21b   :  { %v753_v19 = vrot.slane %v745_v59, 1 }
 0x21c   :  { %v754_v40 = vrot.slane %v746_v4, 1 }
 0x21e   :  { %v755_v54 = vsel %vm391_vm4, %v753_v19, %v754_v40  ;;  %v756_v31 = vsel %vm391_vm4, %v754_v40, %v753_v19 }
 0x21f   :  { %v758_v11 = vsel %vm36_vm5, %v756_v31, 0.0  ;;  %v767_v27 = vadd.f32 %v765_v34, %v755_v54 }
 0x220   :  { %v768_v50 = vadd.f32 %v766_v22, %v758_v11 }
 0x221   :  { %v769_v24 = vmax.f32 %v767_v27, 0.0 }
 0x222   :  { %v770_v46 = vmax.f32 %v768_v50, 0.0 }
 0x223   :  { %771 = vst [vmem:[%s1457_s3] sm:$0xff] %v769_v24 }
 0x224   :  { %772 = vst [vmem:[%s1457_s3 + $0x8] sm:$0xff] %v770_v46 }

</bundles_post_ra>
